<compile_context>
chip_gen: v7x
topology: tpu7x:2x2x1
jax: 0.10.0
libtpu: 0.0.40
codegen_flags: <defaults>
</compile_context>

<pallas_src>
import functools

import jax
import jax.numpy as jnp
from jax.experimental import pallas as pl
from jax.experimental.pallas import tpu as pltpu

LANE = 128
SUBLANE = 8
MAX_BLOCK_ROWS = 1024  # (1024, 128) f32 = 512 KiB per input block


def _combo_kernel(x_ref, t_ref, o_ref, acc_prod, acc_sum, acc_ce, *,
                  alpha, ce_ratio, smooth, eps, n_valid, block_rows, has_tail):
    i = pl.program_id(0)
    nsteps = pl.num_programs(0)

    @pl.when(i == 0)
    def _init():
        acc_prod[...] = jnp.zeros_like(acc_prod)
        acc_sum[...] = jnp.zeros_like(acc_sum)
        acc_ce[...] = jnp.zeros_like(acc_ce)

    x = x_ref[...].astype(jnp.float32)
    t = t_ref[...].astype(jnp.float32)

    def accumulate(valid):
        prod = x * t
        s = x + t
        xc = jnp.clip(x, eps, 1.0 - eps)
        # TODO(synk): if targets were guaranteed binary, a single-log form
        # (jnp.where(t >= 0.5, ...)) would halve EUP work; kept the two-log
        # expression to match the reference exactly for fractional targets.
        ce = alpha * (t * jnp.log(xc)
                      + (1.0 - alpha) * (1.0 - t) * jnp.log(1.0 - xc))
        if valid is not None:
            prod = jnp.where(valid, prod, 0.0)
            s = jnp.where(valid, s, 0.0)
            ce = jnp.where(valid, ce, 0.0)
        acc_prod[...] += prod
        acc_sum[...] += s
        acc_ce[...] += ce

    if not has_tail:
        # Every tile is fully valid: no mask work at all.
        accumulate(None)
    else:
        @pl.when(i < nsteps - 1)
        def _full_tile():
            accumulate(None)

        @pl.when(i == nsteps - 1)
        def _tail_tile():
            row = jax.lax.broadcasted_iota(jnp.int32, (block_rows, LANE), 0)
            col = jax.lax.broadcasted_iota(jnp.int32, (block_rows, LANE), 1)
            elem = (i * block_rows + row) * LANE + col
            accumulate(elem < n_valid)

    @pl.when(i == nsteps - 1)
    def _finalize():
        inter = jnp.sum(acc_prod[...])
        sxt = jnp.sum(acc_sum[...])       # = sum(x) + sum(t)
        so = jnp.sum(acc_ce[...])
        dice = (2.0 * inter + smooth) / (sxt + smooth)
        weighted_ce = -(so / float(n_valid))
        o_ref[0, 0] = ce_ratio * weighted_ce - (1.0 - ce_ratio) * dice


def combo_loss(inputs, targets, smooth=1.0, alpha=0.5, ce_ratio=0.5, eps=1e-9):
    x = inputs.reshape(-1)
    t = targets.reshape(-1)
    n = int(x.shape[0])

    # Pad only to a multiple of 8*128 (and only if needed); the in-kernel
    # iota mask excludes both pad elements and any partial-last-block rows.
    base = SUBLANE * LANE
    padded = pl.cdiv(n, base) * base
    pad = padded - n
    if pad:
        x = jnp.pad(x, (0, pad))
        t = jnp.pad(t, (0, pad))

    rows = padded // LANE
    x2 = x.reshape(rows, LANE)
    t2 = t.reshape(rows, LANE)

    block_rows = min(MAX_BLOCK_ROWS, rows)
    n_blocks = pl.cdiv(rows, block_rows)
    has_tail = (pad != 0) or (rows % block_rows != 0)

    kernel = functools.partial(
        _combo_kernel,
        alpha=float(alpha),
        ce_ratio=float(ce_ratio),
        smooth=float(smooth),
        eps=float(eps),
        n_valid=n,
        block_rows=block_rows,
        has_tail=has_tail,
    )

    blk = pl.BlockSpec((block_rows, LANE), lambda i: (i, 0))

    out = pl.pallas_call(
        kernel,
        out_shape=jax.ShapeDtypeStruct((1, 1), jnp.float32),
        grid_spec=pltpu.PrefetchScalarGridSpec(
            num_scalar_prefetch=0,
            grid=(n_blocks,),
            in_specs=[blk, blk],
            out_specs=pl.BlockSpec(memory_space=pltpu.SMEM),
            scratch_shapes=[
                pltpu.VMEM((block_rows, LANE), jnp.float32),  # sum(x*t)
                pltpu.VMEM((block_rows, LANE), jnp.float32),  # sum(x+t)
                pltpu.VMEM((block_rows, LANE), jnp.float32),  # sum(ce term)
            ],
        ),
        compiler_params=pltpu.CompilerParams(
            dimension_semantics=("arbitrary",)),
    )(x2, t2)
    return out[0, 0]


def combo_loss_ref(inputs, targets, smooth=1.0, alpha=0.5, ce_ratio=0.5, eps=1e-9):
    x = inputs.reshape(-1).astype(jnp.float32)
    t = targets.reshape(-1).astype(jnp.float32)
    intersection = jnp.sum(x * t)
    dice = (2.0 * intersection + smooth) / (jnp.sum(x) + jnp.sum(t) + smooth)
    xc = jnp.clip(x, eps, 1.0 - eps)
    out = alpha * (t * jnp.log(xc) + (1.0 - alpha) * (1.0 - t) * jnp.log(1.0 - xc))
    weighted_ce = -jnp.mean(out)
    return ce_ratio * weighted_ce - (1.0 - ce_ratio) * dice


if __name__ == "__main__":
    key = jax.random.PRNGKey(0)
    k1, k2, k3, k4 = jax.random.split(key, 4)

    # Case 1: ComboLoss expects probabilities for `inputs`, {0,1} for `targets`.
    # 2*4*16*16 = 2048 elements -> no padding, single full tile.
    inputs = jax.random.uniform(k1, (2, 4, 16, 16), dtype=jnp.float32,
                                minval=0.01, maxval=0.99)
    targets = (jax.random.uniform(k2, (2, 4, 16, 16)) > 0.5).astype(jnp.float32)

    loss = combo_loss(inputs, targets)
    jax.block_until_ready(loss)
    ref = combo_loss_ref(inputs, targets)
    assert jnp.allclose(loss, ref, rtol=1e-5, atol=1e-5), (loss, ref)

    # Case 2: ragged size (exercises the in-kernel iota tail mask).
    inputs2 = jax.random.uniform(k3, (3, 5, 7, 11), dtype=jnp.float32,
                                 minval=0.01, maxval=0.99)
    targets2 = (jax.random.uniform(k4, (3, 5, 7, 11)) > 0.5).astype(jnp.float32)

    loss2 = combo_loss(inputs2, targets2)
    jax.block_until_ready(loss2)
    ref2 = combo_loss_ref(inputs2, targets2)
    assert jnp.allclose(loss2, ref2, rtol=1e-5, atol=1e-5), (loss2, ref2)

    print("KERNEL_OK")
</pallas_src>

<mosaic_0001>
module attributes {stable_mosaic.version = 11 : i64} {
  func.func @_combo_kernel(%arg0: i32, %arg1: memref<16x128xf32, #tpu.memory_space<vmem>>, %arg2: memref<16x128xf32, #tpu.memory_space<vmem>>, %arg3: memref<1x1xf32, #tpu.memory_space<smem>>, %arg4: memref<16x128xf32, #tpu.memory_space<vmem>>, %arg5: memref<16x128xf32, #tpu.memory_space<vmem>>, %arg6: memref<16x128xf32, #tpu.memory_space<vmem>>) attributes {dimension_semantics = [#tpu.dimension_semantics<arbitrary>], iteration_bounds = array<i64: 1>, scalar_prefetch = 0 : i64, scratch_operands = 3 : i64, tpu.core_type = #tpu.core_type<tc>, window_params = [{transform_indices = @transform_0, window_bounds = array<i64: 16, 128>}, {transform_indices = @transform_1, window_bounds = array<i64: 16, 128>}, {transform_indices = @transform_2, window_bounds = array<i64: 1, 1>}]} {
    %c0_i32 = arith.constant 0 : i32
    %0 = arith.cmpi eq, %arg0, %c0_i32 : i32
    %1 = arith.extui %0 : i1 to i32
    %c0_i32_0 = arith.constant 0 : i32
    %2 = arith.cmpi ne, %1, %c0_i32_0 : i32
    scf.if %2 {
      %cst_23 = arith.constant 0.000000e+00 : f32
      %36 = vector.broadcast %cst_23 : f32 to vector<16x128xf32>
      %c0_24 = arith.constant 0 : index
      %c0_25 = arith.constant 0 : index
      %37 = vector.load %arg4[%c0_24, %c0_25] : memref<16x128xf32, #tpu.memory_space<vmem>>, vector<16x128xf32>
      tpu.vector_store %arg4[%c0_24, %c0_25], %36 {strides = array<i32>} : memref<16x128xf32, #tpu.memory_space<vmem>>, vector<16x128xf32>,
      %cst_26 = arith.constant 0.000000e+00 : f32
      %38 = vector.broadcast %cst_26 : f32 to vector<16x128xf32>
      %c0_27 = arith.constant 0 : index
      %c0_28 = arith.constant 0 : index
      %39 = vector.load %arg5[%c0_27, %c0_28] : memref<16x128xf32, #tpu.memory_space<vmem>>, vector<16x128xf32>
      tpu.vector_store %arg5[%c0_27, %c0_28], %38 {strides = array<i32>} : memref<16x128xf32, #tpu.memory_space<vmem>>, vector<16x128xf32>,
      %cst_29 = arith.constant 0.000000e+00 : f32
      %40 = vector.broadcast %cst_29 : f32 to vector<16x128xf32>
      %c0_30 = arith.constant 0 : index
      %c0_31 = arith.constant 0 : index
      %41 = vector.load %arg6[%c0_30, %c0_31] : memref<16x128xf32, #tpu.memory_space<vmem>>, vector<16x128xf32>
      tpu.vector_store %arg6[%c0_30, %c0_31], %40 {strides = array<i32>} : memref<16x128xf32, #tpu.memory_space<vmem>>, vector<16x128xf32>,
    } else {
    }
    %c0 = arith.constant 0 : index
    %c0_1 = arith.constant 0 : index
    %3 = vector.load %arg1[%c0, %c0_1] : memref<16x128xf32, #tpu.memory_space<vmem>>, vector<16x128xf32>
    %c0_2 = arith.constant 0 : index
    %c0_3 = arith.constant 0 : index
    %4 = vector.load %arg2[%c0_2, %c0_3] : memref<16x128xf32, #tpu.memory_space<vmem>>, vector<16x128xf32>
    %5 = arith.mulf %3, %4 : vector<16x128xf32>
    %6 = arith.addf %3, %4 : vector<16x128xf32>
    %cst = arith.constant 9.99999971E-10 : f32
    %cst_4 = arith.constant 1.000000e+00 : f32
    %7 = vector.broadcast %cst : f32 to vector<16x128xf32>
    %8 = arith.maximumf %7, %3 : vector<16x128xf32>
    %9 = vector.broadcast %cst_4 : f32 to vector<16x128xf32>
    %10 = arith.minimumf %9, %8 : vector<16x128xf32>
    %11 = math.log %10 : vector<16x128xf32>
    %12 = arith.mulf %4, %11 : vector<16x128xf32>
    %cst_5 = arith.constant 1.000000e+00 : f32
    %13 = vector.broadcast %cst_5 : f32 to vector<16x128xf32>
    %14 = arith.subf %13, %4 : vector<16x128xf32>
    %cst_6 = arith.constant 5.000000e-01 : f32
    %15 = vector.broadcast %cst_6 : f32 to vector<16x128xf32>
    %16 = arith.mulf %15, %14 : vector<16x128xf32>
    %cst_7 = arith.constant 1.000000e+00 : f32
    %17 = vector.broadcast %cst_7 : f32 to vector<16x128xf32>
    %18 = arith.subf %17, %10 : vector<16x128xf32>
    %19 = math.log %18 : vector<16x128xf32>
    %20 = arith.mulf %16, %19 : vector<16x128xf32>
    %21 = arith.addf %12, %20 : vector<16x128xf32>
    %cst_8 = arith.constant 5.000000e-01 : f32
    %22 = vector.broadcast %cst_8 : f32 to vector<16x128xf32>
    %23 = arith.mulf %22, %21 : vector<16x128xf32>
    %c0_9 = arith.constant 0 : index
    %c0_10 = arith.constant 0 : index
    %24 = vector.load %arg4[%c0_9, %c0_10] : memref<16x128xf32, #tpu.memory_space<vmem>>, vector<16x128xf32>
    %25 = arith.addf %24, %5 : vector<16x128xf32>
    %c0_11 = arith.constant 0 : index
    %c0_12 = arith.constant 0 : index
    %26 = vector.load %arg4[%c0_11, %c0_12] : memref<16x128xf32, #tpu.memory_space<vmem>>, vector<16x128xf32>
    tpu.vector_store %arg4[%c0_11, %c0_12], %25 {strides = array<i32>} : memref<16x128xf32, #tpu.memory_space<vmem>>, vector<16x128xf32>,
    %c0_13 = arith.constant 0 : index
    %c0_14 = arith.constant 0 : index
    %27 = vector.load %arg5[%c0_13, %c0_14] : memref<16x128xf32, #tpu.memory_space<vmem>>, vector<16x128xf32>
    %28 = arith.addf %27, %6 : vector<16x128xf32>
    %c0_15 = arith.constant 0 : index
    %c0_16 = arith.constant 0 : index
    %29 = vector.load %arg5[%c0_15, %c0_16] : memref<16x128xf32, #tpu.memory_space<vmem>>, vector<16x128xf32>
    tpu.vector_store %arg5[%c0_15, %c0_16], %28 {strides = array<i32>} : memref<16x128xf32, #tpu.memory_space<vmem>>, vector<16x128xf32>,
    %c0_17 = arith.constant 0 : index
    %c0_18 = arith.constant 0 : index
    %30 = vector.load %arg6[%c0_17, %c0_18] : memref<16x128xf32, #tpu.memory_space<vmem>>, vector<16x128xf32>
    %31 = arith.addf %30, %23 : vector<16x128xf32>
    %c0_19 = arith.constant 0 : index
    %c0_20 = arith.constant 0 : index
    %32 = vector.load %arg6[%c0_19, %c0_20] : memref<16x128xf32, #tpu.memory_space<vmem>>, vector<16x128xf32>
    tpu.vector_store %arg6[%c0_19, %c0_20], %31 {strides = array<i32>} : memref<16x128xf32, #tpu.memory_space<vmem>>, vector<16x128xf32>,
    %c0_i32_21 = arith.constant 0 : i32
    %33 = arith.cmpi eq, %arg0, %c0_i32_21 : i32
    %34 = arith.extui %33 : i1 to i32
    %c0_i32_22 = arith.constant 0 : i32
    %35 = arith.cmpi ne, %34, %c0_i32_22 : i32
    scf.if %35 {
      %c0_23 = arith.constant 0 : index
      %c0_24 = arith.constant 0 : index
      %36 = vector.load %arg4[%c0_23, %c0_24] : memref<16x128xf32, #tpu.memory_space<vmem>>, vector<16x128xf32>
      %37 = vector.shape_cast %36 : vector<16x128xf32> to vector<1x16x128xf32>
      %cst_25 = arith.constant dense<0.000000e+00> : vector<1xf32>
      %38 = vector.multi_reduction <add>, %37, %cst_25 [1, 2] : vector<1x16x128xf32> to vector<1xf32>
      %39 = vector.shape_cast %38 : vector<1xf32> to vector<1x1x1xf32>
      %40 = vector.extract %39[0, 0, 0] : f32 from vector<1x1x1xf32>
      %c0_26 = arith.constant 0 : index
      %c0_27 = arith.constant 0 : index
      %41 = vector.load %arg5[%c0_26, %c0_27] : memref<16x128xf32, #tpu.memory_space<vmem>>, vector<16x128xf32>
      %42 = vector.shape_cast %41 : vector<16x128xf32> to vector<1x16x128xf32>
      %cst_28 = arith.constant dense<0.000000e+00> : vector<1xf32>
      %43 = vector.multi_reduction <add>, %42, %cst_28 [1, 2] : vector<1x16x128xf32> to vector<1xf32>
      %44 = vector.shape_cast %43 : vector<1xf32> to vector<1x1x1xf32>
      %45 = vector.extract %44[0, 0, 0] : f32 from vector<1x1x1xf32>
      %c0_29 = arith.constant 0 : index
      %c0_30 = arith.constant 0 : index
      %46 = vector.load %arg6[%c0_29, %c0_30] : memref<16x128xf32, #tpu.memory_space<vmem>>, vector<16x128xf32>
      %47 = vector.shape_cast %46 : vector<16x128xf32> to vector<1x16x128xf32>
      %cst_31 = arith.constant dense<0.000000e+00> : vector<1xf32>
      %48 = vector.multi_reduction <add>, %47, %cst_31 [1, 2] : vector<1x16x128xf32> to vector<1xf32>
      %49 = vector.shape_cast %48 : vector<1xf32> to vector<1x1x1xf32>
      %50 = vector.extract %49[0, 0, 0] : f32 from vector<1x1x1xf32>
      %cst_32 = arith.constant 2.000000e+00 : f32
      %51 = arith.mulf %cst_32, %40 : f32
      %cst_33 = arith.constant 1.000000e+00 : f32
      %52 = arith.addf %51, %cst_33 : f32
      %cst_34 = arith.constant 1.000000e+00 : f32
      %53 = arith.addf %45, %cst_34 : f32
      %54 = arith.divf %52, %53 : f32
      %cst_35 = arith.constant 2.048000e+03 : f32
      %55 = arith.divf %50, %cst_35 : f32
      %cst_36 = arith.constant 0.000000e+00 : f32
      %56 = arith.subf %cst_36, %55 : f32
      %cst_37 = arith.constant 5.000000e-01 : f32
      %57 = arith.mulf %cst_37, %56 : f32
      %cst_38 = arith.constant 5.000000e-01 : f32
      %58 = arith.mulf %cst_38, %54 : f32
      %59 = arith.subf %57, %58 : f32
      %c0_39 = arith.constant 0 : index
      %c0_40 = arith.constant 0 : index
      %60 = memref.load %arg3[%c0_39, %c0_40] : memref<1x1xf32, #tpu.memory_space<smem>>
      memref.store %59, %arg3[%c0_39, %c0_40] : memref<1x1xf32, #tpu.memory_space<smem>>
    } else {
    }
    return
  }
  func.func @transform_0(%arg0: i32) -> (i32, i32) {
    %c0_i32 = arith.constant 0 : i32
    %c0_i32_0 = arith.constant 0 : i32
    return %arg0, %c0_i32 : i32, i32
  }
  func.func @transform_1(%arg0: i32) -> (i32, i32) {
    %c0_i32 = arith.constant 0 : i32
    %c0_i32_0 = arith.constant 0 : i32
    return %arg0, %c0_i32 : i32, i32
  }
  func.func @transform_2(%arg0: i32) -> (i32, i32) {
    %c0_i32 = arith.constant 0 : i32
    %c0_i32_0 = arith.constant 0 : i32
    %c0_i32_1 = arith.constant 0 : i32
    return %c0_i32, %c0_i32_0 : i32, i32
  }
}

</mosaic_0001>

<bundles_post_ra>
// kernel: tpu_custom_call.1
= control target key start
LH: loop header
LB: loop body
LE: loop exit
PB: predicated region body
PF: predicated region fallthrough
CT: control target
= control target key end

     0   :  { %7 = vsyncpa [#allocation6], 0  ;;  %s311_s0 = inlined_call_operand.hbm [shape: f32[16,128], index: 0, kind: input, shape index: {}]   ;;  %s312_s1 = inlined_call_operand.hbm [shape: f32[16,128], index: 1, kind: input, shape index: {}]   ;;  %s313_s2 = inlined_call_operand.hbm [shape: f32[1,1], index: 2, kind: output, shape index: {}]  }
   0x1   :  { %8 = vsyncpa [#allocation9], 0 }
   0x2   :  { %9 = vsyncpa [#allocation7], 0  ;;  %s255_s9 = smov [#allocation5]   ;;  %s195_s13 = scalar_lea.hbm %s311_s0, 256 }
   0x3   :  { %s15_s10 = sshll.u32 %s255_s9, 4  ;;  %p196_p0 = scmp.ne.s32.totalorder %s311_s0, %s195_s13  ;;  %s16_s10 = int_to_ptr.vmem [resolvable:$true] %s15_s10 }
   0x4   :  { %p199_p1 = scmp.lt.u32.totalorder %s195_s13, %s311_s0 }
   0x6   :  { %p201_p2 = pnand %p199_p1, %p196_p0 }
   0x8   :  { %204 = shalt.err (!%p201_p2)
}
   0x9   :  { %s205_s18 = scalar_lea.vmem %s16_s10, 256  ;;  %p210_p4 = scmp.lt.s32.totalorder %s16_s10, %s16_s10 }
   0xa   :  { %p206_p3 = scmp.ne.s32.totalorder %s16_s10, %s205_s18  ;;  %p211_p5 = scmp.lt.s32.totalorder %s205_s18, %s205_s18 }
   0xc   :  { %p212_p6 = por %p211_p5, %p210_p4 }
   0xe   :  { %p213_p7 = pnand %p212_p6, %p206_p3 }
  0x10   :  { %216 = shalt.err (!%p213_p7)
}
  0x11   :  { %s256_s19 = smov 128   ;;  %s257_s20 = smov 8  }
  0x12   :  { %21 = dma.hbm_to_vmem [thread:$0]  %s311_s0, 256, %s16_s10, [#allocation6], %s256_s19, %s256_s19, %s257_s20  }
  0x13   :  { %s258_s23 = smov [#allocation8]   ;;  %s217_s27 = scalar_lea.hbm %s312_s1, 256 }
  0x14   :  { %s27_s24 = sshll.u32 %s258_s23, 4  ;;  %p218_p8 = scmp.ne.s32.totalorder %s312_s1, %s217_s27  ;;  %s28_s24 = int_to_ptr.vmem [resolvable:$true] %s27_s24 }
  0x15   :  { %p221_p9 = scmp.lt.u32.totalorder %s217_s27, %s312_s1 }
  0x17   :  { %p223_p10 = pnand %p221_p9, %p218_p8 }
  0x19   :  { %226 = shalt.err (!%p223_p10)
}
  0x1a   :  { %s227_s4 = scalar_lea.vmem %s28_s24, 256  ;;  %p232_p12 = scmp.lt.s32.totalorder %s28_s24, %s28_s24 }
  0x1b   :  { %p228_p11 = scmp.ne.s32.totalorder %s28_s24, %s227_s4  ;;  %p233_p13 = scmp.lt.s32.totalorder %s227_s4, %s227_s4 }
  0x1d   :  { %p234_p0 = por %p233_p13, %p232_p12 }
  0x1f   :  { %p235_p1 = pnand %p234_p0, %p228_p11 }
  0x21   :  { %238 = shalt.err (!%p235_p1)
}
  0x22   :  { %33 = dma.hbm_to_vmem [thread:$0]  %s312_s1, 256, %s28_s24, [#allocation9], %s256_s19, %s256_s19, %s257_s20  }
  0x23   :  { %249 = dma.done.wait [#allocation6], 256  }
  0x24   :  { %250 = vsyncadd [#allocation6], 4294967040 }
  0x25   :  { %251 = dma.done.wait [#allocation9], 256  }
  0x26   :  { %252 = vsyncadd [#allocation9], 4294967040  ;;  %v50_v0 = vld [vmem:[#allocation5] sm:$0xff]  ;;  %v51_v1 = vld [vmem:[#allocation5 + $0x8] sm:$0xff]  ;;  %s239_s20 = scalar_lea.hbm %s313_s2, 16 }
  0x27   :  { %v52_v2 = vld [vmem:[#allocation8] sm:$0xff]  ;;  %v53_v3 = vld [vmem:[#allocation8 + $0x8] sm:$0xff]  ;;  %v58_v5 = vmax.f32 %v50_v0, 1e-09  ;;  %v59_v6 = vmax.f32 %v51_v1, 1e-09  ;;  %p240_p2 = scmp.ne.s32.totalorder %s313_s2, %s239_s20  ;;  %p243_p3 = scmp.lt.u32.totalorder %s239_s20, %s313_s2 }
  0x28   :  { %v54_v4 = vmul.f32 %v52_v2, %v50_v0  ;;  %v55_v7 = vmul.f32 %v53_v3, %v51_v1  ;;  %v56_v8 = vadd.f32 %v52_v2, %v50_v0  ;;  %v57_v9 = vadd.f32 %v53_v3, %v51_v1 }
  0x29   :  { %v60_v10 = vmin.f32 %v58_v5, 1.0  ;;  %v61_v11 = vmin.f32 %v59_v6, 1.0  ;;  %v68_v16 = vsub.f32 1.0, %v52_v2  ;;  %v69_v17 = vsub.f32 1.0, %v53_v3  ;;  %p245_p4 = pnand %p243_p3, %p240_p2 }
  0x2a   :  { %v107_v12 = vadd.f32 %v55_v7, %v54_v4  ;;  %v119_v15 = vadd.f32 %v57_v9, %v56_v8 }
  0x2b   :  { %185 = vlog2.f32 %v60_v10  ;;  %v72_v13 = vsub.f32 1.0, %v60_v10  ;;  %v73_v14 = vsub.f32 1.0, %v61_v11  ;;  %v70_v21 = vmul.f32 0.5, %v68_v16 }
  0x2c   :  { %187 = vlog2.f32 %v61_v11  ;;  %108 = vadd.xlane.f32.xlu0 %v107_v12  ;;  %v71_v24 = vmul.f32 0.5, %v69_v17 }
  0x2d   :  { %189 = vlog2.f32 %v72_v13 }
  0x2e   :  { %191 = vlog2.f32 %v73_v14 }
  0x30   :  { %120 = vadd.xlane.f32.xlu0 %v119_v15 }
  0x35   :  { %v186_v18 = vpop.eup %185 }
  0x36   :  { %v188_v19 = vpop.eup %187  ;;  %v63_v20 = vmul.f32 0.6931472, %v186_v18 }
  0x37   :  { %v190_v22 = vpop.eup %189  ;;  %v65_v23 = vmul.f32 0.6931472, %v188_v19 }
  0x38   :  { %v192_v25 = vpop.eup %191  ;;  %v66_v26 = vmul.f32 %v63_v20, %v52_v2  ;;  %v75_v27 = vmul.f32 0.6931472, %v190_v22 }
  0x39   :  { %v67_v28 = vmul.f32 %v65_v23, %v53_v3  ;;  %v77_v29 = vmul.f32 0.6931472, %v192_v25 }
  0x3a   :  { %v78_v30 = vmul.f32 %v75_v27, %v70_v21 }
  0x3b   :  { %v79_v31 = vmul.f32 %v77_v29, %v71_v24 }
  0x3c   :  { %v80_v32 = vadd.f32 %v78_v30, %v66_v26 }
  0x3d   :  { %v81_v33 = vadd.f32 %v79_v31, %v67_v28 }
  0x3e   :  { %v82_v34 = vmul.f32 0.5, %v80_v32 }
  0x3f   :  { %v83_v35 = vmul.f32 0.5, %v81_v33 }
  0x41   :  { %v131_v36 = vadd.f32 %v83_v35, %v82_v34 }
  0x43   :  { %132 = vadd.xlane.f32.xlu1 %v131_v36 }
  0xb9   :  { %v109_v37 = vpop.xlane.xlu0 %108 }
  0xba   :  { %v110_v38 = vrot.slane %v109_v37, 4 }
  0xbc   :  { %v111_v39 = vadd.f32 %v110_v38, %v109_v37 }
  0xbd   :  { %v121_v40 = vpop.xlane.xlu0 %120 }
  0xbe   :  { %v112_v41 = vrot.slane %v111_v39, 2  ;;  %v122_v42 = vrot.slane %v121_v40, 4 }
  0xc0   :  { %v123_v43 = vadd.f32 %v122_v42, %v121_v40  ;;  %v113_v44 = vadd.f32 %v112_v41, %v111_v39 }
  0xc2   :  { %v124_v45 = vrot.slane %v123_v43, 2  ;;  %v114_v46 = vrot.slane %v113_v44, 1 }
  0xc4   :  { %v125_v47 = vadd.f32 %v124_v45, %v123_v43  ;;  %v115_v48 = vadd.f32 %v114_v46, %v113_v44 }
  0xc6   :  { %172 = vpush %v115_v48  ;;  %v126_v49 = vrot.slane %v125_v47, 1 }
  0xc8   :  { %v127_v50 = vadd.f32 %v126_v49, %v125_v47 }
  0xca   :  { %174 = vpush %v127_v50 }
  0xd0   :  { %v133_v51 = vpop.xlane.xlu1 %132 }
  0xd1   :  { %v134_v52 = vrot.slane %v133_v51, 4 }
  0xd3   :  { %v135_v53 = vadd.f32 %v134_v52, %v133_v51 }
  0xd5   :  { %v136_v54 = vrot.slane %v135_v53, 2 }
  0xd7   :  { %v137_v55 = vadd.f32 %v136_v54, %v135_v53 }
  0xd9   :  { %v138_v56 = vrot.slane %v137_v55, 1 }
  0xdb   :  { %v139_v57 = vadd.f32 %v138_v56, %v137_v55 }
  0xdd   :  { %176 = vpush %v139_v57 }
  0xf7   :  { %s173_s1 = spop %172 }
  0xf8   :  { %s141_s10 = smul.f32 2.0, %s173_s1 }
  0xfa   :  { %s142_s12 = sadd.f32 1.0, %s141_s10 }
  0xfb   :  { %s175_s6 = spop %174 }
  0xfc   :  { %s143_s7 = sadd.f32 1.0, %s175_s6 }
  0xfe   :  { %v144_v58 = vstv %s143_s7 }
  0xff   :  { %193 = vrcp.f32 %v144_v58 }
 0x109   :  { %v194_v59 = vpop.eup %193 }
 0x10a   :  { %178 = vpush %v194_v59 }
 0x10e   :  { %s177_s8 = spop %176 }
 0x10f   :  { %s150_s9 = smul.f32 0.00048828125, %s177_s8 }
 0x111   :  { %s151_s11 = ssub.f32 0.0, %s150_s9 }
 0x113   :  { %s152_s15 = smul.f32 0.5, %s151_s11 }
 0x13b   :  { %s179_s13 = spop %178 }
 0x13c   :  { %s147_s14 = smul.f32 %s179_s13, %s142_s12 }
 0x13e   :  { %s153_s16 = smul.f32 0.5, %s147_s14 }
 0x140   :  { %s154_s17 = ssub.f32 %s152_s15, %s153_s16 }
 0x142   :  { %156 = sst [smem:[#allocation10]] %s154_s17 }
 0x143   :  { %248 = shalt.err (!%p245_p4)
}
 0x144   :  { %s259_s25 = smov [#allocation10]  }
 0x145   :  { %164 = dma.smem_to_hbm %s259_s25, 16, %s313_s2, [#allocation7]  }
 0x146   :  { %253 = dma.done.wait [#allocation7], 16  }
 0x147   :  { %254 = vsyncadd [#allocation7], 4294967280 }
 0x148   :  { %168 = sfence }
 0x149   :  { %169 = vsyncpa [#allocation6], 1 }
 0x14a   :  { %170 = vsyncpa [#allocation9], 1 }
 0x14b   :  { %171 = vsyncpa [#allocation7], 1 }

</bundles_post_ra>
